<compile_context>
chip_gen: v7x
topology: tpu7x:2x2x1
jax: 0.10.0
libtpu: 0.0.40
codegen_flags: <defaults>
</compile_context>

<pallas_src>
import functools

import jax
import jax.numpy as jnp
from jax.experimental import pallas as pl
from jax.experimental.pallas import tpu as pltpu


def _round_up(x, m):
    return ((x + m - 1) // m) * m


def _policy_kernel(x_ref, w1_ref, w2_ref, w3_ref, vec_ref, o_ref, *,
                   h1_dim, h2_dim, act_dim, compute_dtype):
    # f32 HBM read; cast to the matmul operand dtype on the VPU (free slot here).
    x = x_ref[...].astype(compute_dtype)       # (bt, obs_dim)
    vec = vec_ref[...]                         # (8, lane_pad), f32

    b1 = vec[0:1, :h1_dim]                     # already includes virtual_t * W1[-1, :]
    b2 = vec[1:2, :h2_dim]
    b3 = vec[2:3, :act_dim]
    scale = vec[3:4, :act_dim]                 # (hi - lo) / 2
    offset = vec[4:5, :act_dim]                # (hi + lo) / 2

    # Layer 1: Linear + ReLU (matmul operands in weight dtype, f32 accumulate/elementwise)
    h1 = jnp.dot(x, w1_ref[...], preferred_element_type=jnp.float32) + b1
    h1 = jnp.maximum(h1, 0.0)

    # Layer 2: Linear + ReLU
    h2 = jnp.dot(h1.astype(w2_ref.dtype), w2_ref[...],
                 preferred_element_type=jnp.float32) + b2
    h2 = jnp.maximum(h2, 0.0)

    # Layer 3: Linear + Identity, then tanh squash / rescale
    z = jnp.dot(h2.astype(w3_ref.dtype), w3_ref[...],
                preferred_element_type=jnp.float32) + b3

    # TODO(synk): act_dim=4 makes this a masked (4-of-128-lane) store; for large-B
    # serving, relayout to a lane-dense (bt//32, 128) row-major view or go feature-major
    # ((features, batch) activations) to make the output stream dense.
    o_ref[...] = (scale * jnp.tanh(z) + offset).astype(o_ref.dtype)


# Flips to False on the first failure of pipeline_mode=pl.Buffered(1) specs.
_RESIDENT_SPECS_OK = True


def finite_horizon_policy(obs, params, virtual_t=1.0, *, batch_tile=None,
                          use_bf16_matmul=True, out_dtype=jnp.float32):
    """obs: (B, obs_dim) f32.  Returns action: (B, act_dim) in `out_dtype`.

    Note: use_bf16_matmul=True casts matmul operands to bf16 (accumulation stays f32),
    introducing ~1e-2-level error vs a pure-f32 torch reference.
    """
    global _RESIDENT_SPECS_OK

    w1, b1, w2, b2, w3, b3, act_high, act_low = params
    B, obs_dim = obs.shape
    assert w1.shape[0] == obs_dim + 1, "W1 must include the virtual-t row"
    h1_dim = w1.shape[1]
    h2_dim = w2.shape[1]
    act_dim = w3.shape[1]

    compute_dtype = jnp.bfloat16 if use_bf16_matmul else jnp.float32

    # --- parameter preprocessing (tiny, once per call, in f32) ---
    # Fold the virtual time-step column into the first-layer bias.
    b1_eff = b1.astype(jnp.float32) + jnp.float32(virtual_t) * w1[-1, :].astype(jnp.float32)
    w1_obs = w1[:obs_dim, :].astype(compute_dtype)     # drop virtual-t row (folded into b1')
    w2_c = w2.astype(compute_dtype)
    w3_c = w3.astype(compute_dtype)

    scale = (act_high.astype(jnp.float32) - act_low.astype(jnp.float32)) * 0.5
    offset = (act_high.astype(jnp.float32) + act_low.astype(jnp.float32)) * 0.5

    # Pack all small per-layer vectors into a single lane-padded (8, lane_pad) block.
    lane_pad = _round_up(max(h1_dim, h2_dim, act_dim, 128), 128)
    vec = jnp.zeros((8, lane_pad), jnp.float32)
    vec = vec.at[0, :h1_dim].set(b1_eff)
    vec = vec.at[1, :h2_dim].set(b2.astype(jnp.float32))
    vec = vec.at[2, :act_dim].set(b3.astype(jnp.float32))
    vec = vec.at[3, :act_dim].set(scale.reshape(act_dim))
    vec = vec.at[4, :act_dim].set(offset.reshape(act_dim))

    # --- batch tiling: no wrapper pad / cast; partial last block handled by the grid ---
    sublane = 8  # obs is read as f32
    if batch_tile is None:
        cap = 4096  # double-buffered working set ~< 4 MiB: far under scoped VMEM everywhere
        if B <= 2 * sublane:
            batch_tile = _round_up(max(B, 1), sublane)
        else:
            # Keep >= 2 grid steps so ("parallel",) can shard the batch over v7x's 2 TCs.
            n_steps = max(2, pl.cdiv(B, cap))
            batch_tile = _round_up(pl.cdiv(B, n_steps), sublane)
    else:
        batch_tile = max(sublane, _round_up(batch_tile, sublane))
    grid_steps = pl.cdiv(B, batch_tile)

    kernel = functools.partial(_policy_kernel, h1_dim=h1_dim, h2_dim=h2_dim,
                               act_dim=act_dim, compute_dtype=compute_dtype)

    def nbytes(a):
        return a.size * a.dtype.itemsize

    cost = pl.CostEstimate(
        flops=int(2 * B * (obs_dim * h1_dim + h1_dim * h2_dim + h2_dim * act_dim)),
        transcendentals=int(B * act_dim),
        bytes_accessed=int(nbytes(obs) + B * act_dim * jnp.dtype(out_dtype).itemsize
                           + nbytes(w1_obs) + nbytes(w2_c) + nbytes(w3_c) + nbytes(vec)),
    )

    def batch_map(i):
        return (i, 0)

    def fixed_map(i):
        return (0, 0)

    def run(resident_specs):
        # Grid-invariant operands: Buffered(1) trims the unused second pipeline buffer.
        extra = dict(pipeline_mode=pl.Buffered(1)) if resident_specs else {}
        in_specs = [
            pl.BlockSpec((batch_tile, obs_dim), batch_map),        # f32 obs tile
            pl.BlockSpec((obs_dim, h1_dim), fixed_map, **extra),   # W1 (obs rows only)
            pl.BlockSpec((h1_dim, h2_dim), fixed_map, **extra),    # W2
            pl.BlockSpec((h2_dim, act_dim), fixed_map, **extra),   # W3
            pl.BlockSpec((8, lane_pad), fixed_map, **extra),       # packed b1'/b2/b3/scale/offset
        ]
        return pl.pallas_call(
            kernel,
            out_shape=jax.ShapeDtypeStruct((B, act_dim), out_dtype),
            grid_spec=pltpu.PrefetchScalarGridSpec(
                num_scalar_prefetch=0,
                grid=(grid_steps,),
                in_specs=in_specs,
                out_specs=pl.BlockSpec((batch_tile, act_dim), batch_map),
            ),
            compiler_params=pltpu.CompilerParams(
                dimension_semantics=("parallel",)),
            cost_estimate=cost,
        )(obs, w1_obs, w2_c, w3_c, vec)

    if _RESIDENT_SPECS_OK:
        try:
            return run(True)
        except Exception:
            _RESIDENT_SPECS_OK = False
    return run(False)


def make_params(key, obs_dim, act_dim, hidden_sizes):
    """Deterministic synthetic parameters (shapes match the torch module)."""
    sizes = [obs_dim + 1] + list(hidden_sizes) + [act_dim]
    keys = jax.random.split(key, 2 * (len(sizes) - 1))
    params = []
    for j in range(len(sizes) - 1):
        fan_in, fan_out = sizes[j], sizes[j + 1]
        bound = 1.0 / jnp.sqrt(fan_in)
        w = jax.random.uniform(keys[2 * j], (fan_in, fan_out),
                               minval=-bound, maxval=bound, dtype=jnp.float32)
        b = jax.random.uniform(keys[2 * j + 1], (fan_out,),
                               minval=-bound, maxval=bound, dtype=jnp.float32)
        params += [w, b]
    act_high = jnp.full((act_dim,), 2.0, dtype=jnp.float32)
    act_low = jnp.full((act_dim,), -1.0, dtype=jnp.float32)
    params += [act_high, act_low]
    return tuple(params)


def reference_forward(obs, params, virtual_t=1.0):
    """Pure-JAX mirror of the PyTorch module (f32 end-to-end, highest precision)."""
    w1, b1, w2, b2, w3, b3, hi, lo = params
    hp = jax.lax.Precision.HIGHEST
    t_col = jnp.full((obs.shape[0], 1), virtual_t, dtype=jnp.float32)
    x = jnp.concatenate((obs, t_col), axis=1)
    h1 = jnp.maximum(jnp.dot(x, w1, precision=hp) + b1, 0.0)
    h2 = jnp.maximum(jnp.dot(h1, w2, precision=hp) + b2, 0.0)
    z = jnp.dot(h2, w3, precision=hp) + b3
    return (hi - lo) / 2.0 * jnp.tanh(z) + (hi + lo) / 2.0


if __name__ == "__main__":
    key = jax.random.PRNGKey(0)
    k_obs, k_params, k_obs2 = jax.random.split(key, 3)

    obs_dim = 15           # module expands to 16 via the virtual-t column
    act_dim = 4
    hidden_sizes = (32, 32)
    params = make_params(k_params, obs_dim, act_dim, hidden_sizes)

    # 1) Small batch, f32 path (checks layout / bias fold / rescale; single grid step).
    obs = jax.random.normal(k_obs, (8, obs_dim), dtype=jnp.float32)
    act_f32 = jax.block_until_ready(
        finite_horizon_policy(obs, params, virtual_t=1.0, use_bf16_matmul=False))
    ref = reference_forward(obs, params, virtual_t=1.0)
    assert act_f32.shape == (8, act_dim)
    assert jnp.allclose(act_f32, ref, atol=1e-3, rtol=1e-3)

    # 2) Non-divisible batch with an explicit small tile: 3 grid steps incl. a partial
    #    last block (300 = 128 + 128 + 44), bf16 matmul operands.
    obs2 = jax.random.normal(k_obs2, (300, obs_dim), dtype=jnp.float32)
    act_bf16 = jax.block_until_ready(
        finite_horizon_policy(obs2, params, virtual_t=1.0, batch_tile=128))
    ref2 = reference_forward(obs2, params, virtual_t=1.0)
    assert act_bf16.shape == (300, act_dim)
    assert jnp.allclose(act_bf16, ref2, atol=5e-2, rtol=5e-2)

    # 3) Default tile selection: auto-splits into >= 2 grid steps (v7x megacore rule),
    #    again with a partial last block.
    act_auto = jax.block_until_ready(
        finite_horizon_policy(obs2, params, virtual_t=1.0))
    assert act_auto.shape == (300, act_dim)
    assert jnp.allclose(act_auto, ref2, atol=5e-2, rtol=5e-2)

    print("KERNEL_OK")
</pallas_src>

<mosaic_0001>
module attributes {stable_mosaic.version = 11 : i64} {
  func.func @_policy_kernel(%arg0: i32, %arg1: memref<8x15xf32, #tpu.memory_space<vmem>>, %arg2: memref<15x32xf32, #tpu.memory_space<vmem>>, %arg3: memref<32x32xf32, #tpu.memory_space<vmem>>, %arg4: memref<32x4xf32, #tpu.memory_space<vmem>>, %arg5: memref<8x128xf32, #tpu.memory_space<vmem>>, %arg6: memref<8x4xf32, #tpu.memory_space<vmem>>) attributes {dimension_semantics = [#tpu.dimension_semantics<parallel>], iteration_bounds = array<i64: 1>, scalar_prefetch = 0 : i64, scratch_operands = 0 : i64, tpu.core_type = #tpu.core_type<tc>, window_params = [{transform_indices = @transform_0, window_bounds = array<i64: 8, 15>}, {pipeline_mode = #tpu.pipeline_mode<synchronous>, transform_indices = @transform_1, window_bounds = array<i64: 15, 32>}, {pipeline_mode = #tpu.pipeline_mode<synchronous>, transform_indices = @transform_2, window_bounds = array<i64: 32, 32>}, {pipeline_mode = #tpu.pipeline_mode<synchronous>, transform_indices = @transform_3, window_bounds = array<i64: 32, 4>}, {pipeline_mode = #tpu.pipeline_mode<synchronous>, transform_indices = @transform_4, window_bounds = array<i64: 8, 128>}, {transform_indices = @transform_5, window_bounds = array<i64: 8, 4>}]} {
    %c0 = arith.constant 0 : index
    %c0_0 = arith.constant 0 : index
    %0 = vector.load %arg1[%c0, %c0_0] : memref<8x15xf32, #tpu.memory_space<vmem>>, vector<8x15xf32>
    %c0_1 = arith.constant 0 : index
    %c0_2 = arith.constant 0 : index
    %1 = vector.load %arg5[%c0_1, %c0_2] : memref<8x128xf32, #tpu.memory_space<vmem>>, vector<8x128xf32>
    %2 = vector.extract_strided_slice %1 {offsets = [0, 0], sizes = [1, 32], strides = [1, 1]} : vector<8x128xf32> to vector<1x32xf32>
    %3 = vector.extract_strided_slice %1 {offsets = [1, 0], sizes = [1, 32], strides = [1, 1]} : vector<8x128xf32> to vector<1x32xf32>
    %4 = vector.extract_strided_slice %1 {offsets = [2, 0], sizes = [1, 4], strides = [1, 1]} : vector<8x128xf32> to vector<1x4xf32>
    %5 = vector.extract_strided_slice %1 {offsets = [3, 0], sizes = [1, 4], strides = [1, 1]} : vector<8x128xf32> to vector<1x4xf32>
    %6 = vector.extract_strided_slice %1 {offsets = [4, 0], sizes = [1, 4], strides = [1, 1]} : vector<8x128xf32> to vector<1x4xf32>
    %c0_3 = arith.constant 0 : index
    %c0_4 = arith.constant 0 : index
    %7 = vector.load %arg2[%c0_3, %c0_4] : memref<15x32xf32, #tpu.memory_space<vmem>>, vector<15x32xf32>
    %cst = arith.constant dense<0.000000e+00> : vector<8x32xf32>
    %8 = tpu.matmul %0, %7, %cst {dimension_numbers = #tpu.dot_dimension_numbers<[1], [0], [0], [1], [0, 0, 1, 1], [], []>} : vector<8x15xf32>, vector<15x32xf32>, vector<8x32xf32> -> vector<8x32xf32>
    %9 = vector.broadcast %2 : vector<1x32xf32> to vector<8x32xf32>
    %10 = arith.addf %8, %9 : vector<8x32xf32>
    %cst_5 = arith.constant 0.000000e+00 : f32
    %11 = vector.broadcast %cst_5 : f32 to vector<8x32xf32>
    %12 = arith.maximumf %10, %11 : vector<8x32xf32>
    %c0_6 = arith.constant 0 : index
    %c0_7 = arith.constant 0 : index
    %13 = vector.load %arg3[%c0_6, %c0_7] : memref<32x32xf32, #tpu.memory_space<vmem>>, vector<32x32xf32>
    %cst_8 = arith.constant dense<0.000000e+00> : vector<8x32xf32>
    %14 = tpu.matmul %12, %13, %cst_8 {dimension_numbers = #tpu.dot_dimension_numbers<[1], [0], [0], [1], [0, 0, 1, 1], [], []>} : vector<8x32xf32>, vector<32x32xf32>, vector<8x32xf32> -> vector<8x32xf32>
    %15 = vector.broadcast %3 : vector<1x32xf32> to vector<8x32xf32>
    %16 = arith.addf %14, %15 : vector<8x32xf32>
    %cst_9 = arith.constant 0.000000e+00 : f32
    %17 = vector.broadcast %cst_9 : f32 to vector<8x32xf32>
    %18 = arith.maximumf %16, %17 : vector<8x32xf32>
    %c0_10 = arith.constant 0 : index
    %c0_11 = arith.constant 0 : index
    %19 = vector.load %arg4[%c0_10, %c0_11] : memref<32x4xf32, #tpu.memory_space<vmem>>, vector<32x4xf32>
    %cst_12 = arith.constant dense<0.000000e+00> : vector<8x4xf32>
    %20 = tpu.matmul %18, %19, %cst_12 {dimension_numbers = #tpu.dot_dimension_numbers<[1], [0], [0], [1], [0, 0, 1, 1], [], []>} : vector<8x32xf32>, vector<32x4xf32>, vector<8x4xf32> -> vector<8x4xf32>
    %21 = vector.broadcast %4 : vector<1x4xf32> to vector<8x4xf32>
    %22 = arith.addf %20, %21 : vector<8x4xf32>
    %23 = math.tanh %22 : vector<8x4xf32>
    %24 = vector.broadcast %5 : vector<1x4xf32> to vector<8x4xf32>
    %25 = arith.mulf %24, %23 : vector<8x4xf32>
    %26 = vector.broadcast %6 : vector<1x4xf32> to vector<8x4xf32>
    %27 = arith.addf %25, %26 : vector<8x4xf32>
    %c0_13 = arith.constant 0 : index
    %c0_14 = arith.constant 0 : index
    %28 = vector.load %arg6[%c0_13, %c0_14] : memref<8x4xf32, #tpu.memory_space<vmem>>, vector<8x4xf32>
    tpu.vector_store %arg6[%c0_13, %c0_14], %27 {strides = array<i32>} : memref<8x4xf32, #tpu.memory_space<vmem>>, vector<8x4xf32>,
    return
  }
  func.func @transform_0(%arg0: i32) -> (i32, i32) {
    %c0_i32 = arith.constant 0 : i32
    %c0_i32_0 = arith.constant 0 : i32
    return %arg0, %c0_i32 : i32, i32
  }
  func.func @transform_1(%arg0: i32) -> (i32, i32) {
    %c0_i32 = arith.constant 0 : i32
    %c0_i32_0 = arith.constant 0 : i32
    %c0_i32_1 = arith.constant 0 : i32
    return %c0_i32, %c0_i32_0 : i32, i32
  }
  func.func @transform_2(%arg0: i32) -> (i32, i32) {
    %c0_i32 = arith.constant 0 : i32
    %c0_i32_0 = arith.constant 0 : i32
    %c0_i32_1 = arith.constant 0 : i32
    return %c0_i32, %c0_i32_0 : i32, i32
  }
  func.func @transform_3(%arg0: i32) -> (i32, i32) {
    %c0_i32 = arith.constant 0 : i32
    %c0_i32_0 = arith.constant 0 : i32
    %c0_i32_1 = arith.constant 0 : i32
    return %c0_i32, %c0_i32_0 : i32, i32
  }
  func.func @transform_4(%arg0: i32) -> (i32, i32) {
    %c0_i32 = arith.constant 0 : i32
    %c0_i32_0 = arith.constant 0 : i32
    %c0_i32_1 = arith.constant 0 : i32
    return %c0_i32, %c0_i32_0 : i32, i32
  }
  func.func @transform_5(%arg0: i32) -> (i32, i32) {
    %c0_i32 = arith.constant 0 : i32
    %c0_i32_0 = arith.constant 0 : i32
    return %arg0, %c0_i32 : i32, i32
  }
}

module attributes {stable_mosaic.version = 11 : i64} {
  func.func @_policy_kernel(%arg0: i32, %arg1: memref<8x15xf32, #tpu.memory_space<vmem>>, %arg2: memref<15x32xf32, #tpu.memory_space<vmem>>, %arg3: memref<32x32xf32, #tpu.memory_space<vmem>>, %arg4: memref<32x4xf32, #tpu.memory_space<vmem>>, %arg5: memref<8x128xf32, #tpu.memory_space<vmem>>, %arg6: memref<8x4xf32, #tpu.memory_space<vmem>>) attributes {dimension_semantics = [#tpu.dimension_semantics<parallel>], iteration_bounds = array<i64: 1>, scalar_prefetch = 0 : i64, scratch_operands = 0 : i64, tpu.core_type = #tpu.core_type<tc>, window_params = [{transform_indices = @transform_0, window_bounds = array<i64: 8, 15>}, {pipeline_mode = #tpu.pipeline_mode<synchronous>, transform_indices = @transform_1, window_bounds = array<i64: 15, 32>}, {pipeline_mode = #tpu.pipeline_mode<synchronous>, transform_indices = @transform_2, window_bounds = array<i64: 32, 32>}, {pipeline_mode = #tpu.pipeline_mode<synchronous>, transform_indices = @transform_3, window_bounds = array<i64: 32, 4>}, {pipeline_mode = #tpu.pipeline_mode<synchronous>, transform_indices = @transform_4, window_bounds = array<i64: 8, 128>}, {transform_indices = @transform_5, window_bounds = array<i64: 8, 4>}]} {
    %c0 = arith.constant 0 : index
    %c0_0 = arith.constant 0 : index
    %0 = vector.load %arg1[%c0, %c0_0] : memref<8x15xf32, #tpu.memory_space<vmem>>, vector<8x15xf32>
    %c0_1 = arith.constant 0 : index
    %c0_2 = arith.constant 0 : index
    %1 = vector.load %arg5[%c0_1, %c0_2] : memref<8x128xf32, #tpu.memory_space<vmem>>, vector<8x128xf32>
    %2 = vector.extract_strided_slice %1 {offsets = [0, 0], sizes = [1, 32], strides = [1, 1]} : vector<8x128xf32> to vector<1x32xf32>
    %3 = vector.extract_strided_slice %1 {offsets = [1, 0], sizes = [1, 32], strides = [1, 1]} : vector<8x128xf32> to vector<1x32xf32>
    %4 = vector.extract_strided_slice %1 {offsets = [2, 0], sizes = [1, 4], strides = [1, 1]} : vector<8x128xf32> to vector<1x4xf32>
    %5 = vector.extract_strided_slice %1 {offsets = [3, 0], sizes = [1, 4], strides = [1, 1]} : vector<8x128xf32> to vector<1x4xf32>
    %6 = vector.extract_strided_slice %1 {offsets = [4, 0], sizes = [1, 4], strides = [1, 1]} : vector<8x128xf32> to vector<1x4xf32>
    %c0_3 = arith.constant 0 : index
    %c0_4 = arith.constant 0 : index
    %7 = vector.load %arg2[%c0_3, %c0_4] : memref<15x32xf32, #tpu.memory_space<vmem>>, vector<15x32xf32>
    %cst = arith.constant dense<0.000000e+00> : vector<8x32xf32>
    %8 = tpu.matmul %0, %7, %cst {dimension_numbers = #tpu.dot_dimension_numbers<[1], [0], [0], [1], [0, 0, 1, 1], [], []>} : vector<8x15xf32>, vector<15x32xf32>, vector<8x32xf32> -> vector<8x32xf32>
    %9 = vector.broadcast %2 : vector<1x32xf32> to vector<8x32xf32>
    %10 = arith.addf %8, %9 : vector<8x32xf32>
    %cst_5 = arith.constant 0.000000e+00 : f32
    %11 = vector.broadcast %cst_5 : f32 to vector<8x32xf32>
    %12 = arith.maximumf %10, %11 : vector<8x32xf32>
    %c0_6 = arith.constant 0 : index
    %c0_7 = arith.constant 0 : index
    %13 = vector.load %arg3[%c0_6, %c0_7] : memref<32x32xf32, #tpu.memory_space<vmem>>, vector<32x32xf32>
    %cst_8 = arith.constant dense<0.000000e+00> : vector<8x32xf32>
    %14 = tpu.matmul %12, %13, %cst_8 {dimension_numbers = #tpu.dot_dimension_numbers<[1], [0], [0], [1], [0, 0, 1, 1], [], []>} : vector<8x32xf32>, vector<32x32xf32>, vector<8x32xf32> -> vector<8x32xf32>
    %15 = vector.broadcast %3 : vector<1x32xf32> to vector<8x32xf32>
    %16 = arith.addf %14, %15 : vector<8x32xf32>
    %cst_9 = arith.constant 0.000000e+00 : f32
    %17 = vector.broadcast %cst_9 : f32 to vector<8x32xf32>
    %18 = arith.maximumf %16, %17 : vector<8x32xf32>
    %c0_10 = arith.constant 0 : index
    %c0_11 = arith.constant 0 : index
    %19 = vector.load %arg4[%c0_10, %c0_11] : memref<32x4xf32, #tpu.memory_space<vmem>>, vector<32x4xf32>
    %cst_12 = arith.constant dense<0.000000e+00> : vector<8x4xf32>
    %20 = tpu.matmul %18, %19, %cst_12 {dimension_numbers = #tpu.dot_dimension_numbers<[1], [0], [0], [1], [0, 0, 1, 1], [], []>} : vector<8x32xf32>, vector<32x4xf32>, vector<8x4xf32> -> vector<8x4xf32>
    %21 = vector.broadcast %4 : vector<1x4xf32> to vector<8x4xf32>
    %22 = arith.addf %20, %21 : vector<8x4xf32>
    %23 = math.tanh %22 : vector<8x4xf32>
    %24 = vector.broadcast %5 : vector<1x4xf32> to vector<8x4xf32>
    %25 = arith.mulf %24, %23 : vector<8x4xf32>
    %26 = vector.broadcast %6 : vector<1x4xf32> to vector<8x4xf32>
    %27 = arith.addf %25, %26 : vector<8x4xf32>
    %c0_13 = arith.constant 0 : index
    %c0_14 = arith.constant 0 : index
    %28 = vector.load %arg6[%c0_13, %c0_14] : memref<8x4xf32, #tpu.memory_space<vmem>>, vector<8x4xf32>
    tpu.vector_store %arg6[%c0_13, %c0_14], %27 {strides = array<i32>} : memref<8x4xf32, #tpu.memory_space<vmem>>, vector<8x4xf32>,
    return
  }
  func.func @transform_0(%arg0: i32) -> (i32, i32) {
    %c0_i32 = arith.constant 0 : i32
    %c0_i32_0 = arith.constant 0 : i32
    return %arg0, %c0_i32 : i32, i32
  }
  func.func @transform_1(%arg0: i32) -> (i32, i32) {
    %c0_i32 = arith.constant 0 : i32
    %c0_i32_0 = arith.constant 0 : i32
    %c0_i32_1 = arith.constant 0 : i32
    return %c0_i32, %c0_i32_0 : i32, i32
  }
  func.func @transform_2(%arg0: i32) -> (i32, i32) {
    %c0_i32 = arith.constant 0 : i32
    %c0_i32_0 = arith.constant 0 : i32
    %c0_i32_1 = arith.constant 0 : i32
    return %c0_i32, %c0_i32_0 : i32, i32
  }
  func.func @transform_3(%arg0: i32) -> (i32, i32) {
    %c0_i32 = arith.constant 0 : i32
    %c0_i32_0 = arith.constant 0 : i32
    %c0_i32_1 = arith.constant 0 : i32
    return %c0_i32, %c0_i32_0 : i32, i32
  }
  func.func @transform_4(%arg0: i32) -> (i32, i32) {
    %c0_i32 = arith.constant 0 : i32
    %c0_i32_0 = arith.constant 0 : i32
    %c0_i32_1 = arith.constant 0 : i32
    return %c0_i32, %c0_i32_0 : i32, i32
  }
  func.func @transform_5(%arg0: i32) -> (i32, i32) {
    %c0_i32 = arith.constant 0 : i32
    %c0_i32_0 = arith.constant 0 : i32
    return %arg0, %c0_i32 : i32, i32
  }
}

</mosaic_0001>

<bundles_post_ra>
// kernel: tpu_custom_call.1
= control target key start
LH: loop header
LB: loop body
LE: loop exit
PB: predicated region body
PF: predicated region fallthrough
CT: control target
= control target key end

     0   :  { %10 = vsyncpa [#allocation3], 0  ;;  %s398_s18 = smov [#allocation2]   ;;  %s483_s0 = inlined_call_operand.vmem [shape: f32[8,15], index: 0, kind: input, shape index: {}]   ;;  %s484_s1 = inlined_call_operand.hbm [shape: f32[15,32], index: 1, kind: input, shape index: {}]   ;;  %s485_s2 = inlined_call_operand.vmem [shape: f32[32,32], index: 2, kind: input, shape index: {}]   ;;  %s486_s3 = inlined_call_operand.vmem [shape: f32[32,4], index: 3, kind: input, shape index: {}]   ;;  %s487_s4 = inlined_call_operand.vmem [shape: f32[8,128], index: 4, kind: input, shape index: {}]   ;;  %s488_s5 = inlined_call_operand.vmem [shape: f32[8,4], index: 5, kind: output, shape index: {}]  }
   0x1   :  { %s18_s19 = sshll.u32 %s398_s18, 4  ;;  %s374_s22 = scalar_lea.hbm %s484_s1, 256  ;;  %s19_s19 = int_to_ptr.vmem [resolvable:$true] %s18_s19 }
   0x2   :  { %p375_p0 = scmp.ne.s32.totalorder %s484_s1, %s374_s22  ;;  %p378_p1 = scmp.lt.u32.totalorder %s374_s22, %s484_s1 }
   0x4   :  { %p380_p2 = pnand %p378_p1, %p375_p0 }
   0x6   :  { %383 = shalt.err (!%p380_p2)
}
   0x7   :  { %s384_s27 = scalar_lea.vmem %s19_s19, 256  ;;  %p389_p4 = scmp.lt.s32.totalorder %s19_s19, %s19_s19 }
   0x8   :  { %p385_p3 = scmp.ne.s32.totalorder %s19_s19, %s384_s27  ;;  %p390_p5 = scmp.lt.s32.totalorder %s384_s27, %s384_s27 }
   0xa   :  { %p391_p6 = por %p390_p5, %p389_p4 }
   0xc   :  { %p392_p7 = pnand %p391_p6, %p385_p3 }
   0xe   :  { %395 = shalt.err (!%p392_p7)
}
   0xf   :  { %s399_s28 = smov 128   ;;  %s400_s29 = smov 8  }
  0x10   :  { %24 = dma.hbm_to_vmem [thread:$0]  %s484_s1, 256, %s19_s19, [#allocation3], %s399_s28, %s399_s28, %s400_s29  }
  0x11   :  { %396 = dma.done.wait [#allocation3], 256  }
  0x12   :  { %397 = vsyncadd [#allocation3], 4294967040  ;;  %v401_v0 = vmov 0.0|0.0   ;;  %vm402_vm0 = vmmov 0   ;;  %v403_v1 = vmov 0.0   ;;  %vm46_vm1 = vcmask 1046528  }
  0x13   :  { %349 = vmatprep.subr.bf16.mxu0 %v401_v0  ;;  %353 = vmatprep.subr.bf16.mxu1 %v401_v0  ;;  %v36_v2 = vld [vmem:[#allocation2] sm:$0xff]  ;;  %v37_v3 = vld [vmem:[#allocation2 + $0x8] sm:$0x7f]  ;;  %vm404_vm2 = vmmov 1   ;;  %vm42_vm4 = vcmask 121856   ;;  %v123_v9 = vld [vmem:[%s485_s2 + $0x10] sm:$0xff]  ;;  %v38_v15 = vlaneseq }
  0x14   :  { %324 = vmatprep.mubr.msk.f32.mxu0 %vm402_vm0, %v403_v1  ;;  %335 = vmatprep.mubr.msk.f32.mxu1 %vm402_vm0, %v403_v1  ;;  %vm351_vm3 = vmpackc.low %vm46_vm1, %vm404_vm2  ;;  %v350_v4 = vpack.c.bf16 %v37_v3, %v36_v2  ;;  %v121_v5 = vld [vmem:[%s485_s2] sm:$0xff]  ;;  %v122_v6 = vld [vmem:[%s485_s2 + $0x8] sm:$0xff]  ;;  %vm129_vm5 = vcmask 261120   ;;  %vm296_vm6 = vcmask 31744  }
  0x15   :  { %v354_v7 = vpack.c.bf16 %v122_v6, %v121_v5  ;;  %v34_v8 = vld [vmem:[%s483_s0] sm:$0xff]  ;;  %v124_v10 = vld [vmem:[%s485_s2 + $0x18] sm:$0xff]  ;;  %v205_v13 = vld [vmem:[%s486_s3 + $0x8] sm:$0xff]  ;;  %v39_v16 = vshrl.u32 %v38_v15, 7 }
  0x16   :  { %352 = vmatpush3.bf16.msk.msra.mxu0 %vm351_vm3, %v350_v4  ;;  %v357_v11 = vpack.c.bf16 %v124_v10, %v123_v9  ;;  %v204_v12 = vld [vmem:[%s486_s3] sm:$0xff]  ;;  %v206_v24 = vld [vmem:[%s486_s3 + $0x10] sm:$0xff]  ;;  %v207_v25 = vld [vmem:[%s486_s3 + $0x18] sm:$0xff] }
  0x17   :  { %355 = vmatpush3.bf16.msra.mxu1 %v354_v7  ;;  %359 = vmatprep.subr.bf16.mxu0 %v401_v0  ;;  %v360_v14 = vpack.c.bf16 %v205_v13, %v204_v12  ;;  %v40_v17 = vsub.s32 0, %v39_v16  ;;  %v35_v18 = vld [vmem:[%s487_s4] sm:$0xff]  ;;  %v363_v26 = vpack.c.bf16 %v207_v25, %v206_v24  ;;  %v127_v27 = vsub.s32 1, %v39_v16 }
  0x18   :  { %356 = vmatprep.subr.bf16.mxu1 %v401_v0  ;;  %v210_v33 = vsub.s32 2, %v39_v16  ;;  %v288_v38 = vsub.s32 3, %v39_v16  ;;  %v293_v39 = vsub.s32 4, %v39_v16 }
  0x19   :  { %325 = vmatmul.mubr.msk.f32.vlgmr.msra.gmra.mrb[0].mxu0 %vm42_vm4, %v34_v8  ;;  %v41_v19 = vrot.slane %v35_v18, %v40_v17  ;;  %v128_v28 = vrot.slane %v35_v18, %v127_v27 }
  0x1a   :  { %346 = vmatprep.mubr.msk.f32.mxu0 %vm402_vm0, %v403_v1  ;;  %361 = vmatpush3.bf16.msra.mxu0 %v360_v14  ;;  %v211_v34 = vrot.slane %v35_v18, %v210_v33  ;;  %v289_v40 = vrot.slane %v35_v18, %v288_v38  ;;  %v294_v41 = vrot.slane %v35_v18, %v293_v39 }
  0x1b   :  { %358 = vmatpush3.bf16.msra.mxu1 %v357_v11  ;;  %362 = vmatprep.subr.bf16.mxu0 %v401_v0 }
  0x1e   :  { %364 = vmatpush3.bf16.msra.mxu0 %v363_v26 }
  0xec   :  { %v116_v20 = vpop.f32.mrb[0].mxu0 }
  0xed   :  { %v117_v21 = vadd.f32 %v116_v20, %v41_v19  ;;  %v326_v22 = vpop.f32.mrb[1].mxu0 }
  0xef   :  { %v120_v23 = vmax.f32 %v117_v21, 0.0 }
  0xf1   :  { %336 = vmatmul.mubr.msk.f32.vlgmr.msra.gmra.mrb[0].mxu1 %vm129_vm5, %v120_v23 }
 0x1c4   :  { %v199_v29 = vpop.f32.mrb[0].mxu1 }
 0x1c5   :  { %v200_v30 = vadd.f32 %v199_v29, %v128_v28  ;;  %v337_v31 = vpop.f32.mrb[1].mxu1 }
 0x1c7   :  { %v203_v32 = vmax.f32 %v200_v30, 0.0 }
 0x1c9   :  { %347 = vmatmul.mubr.msk.f32.vlgmr.msra.gmra.mrb[2].mxu0 %vm129_vm5, %v203_v32 }
 0x29c   :  { %v281_v35 = vpop.f32.mrb[2].mxu0 }
 0x29d   :  { %v282_v36 = vadd.f32 %v281_v35, %v211_v34  ;;  %v348_v37 = vpop.f32.mrb[3].mxu0 }
 0x29f   :  { %372 = vtanh.f32 %v282_v36 }
 0x2a9   :  { %v373_v42 = vpop.eup %372 }
 0x2aa   :  { %v290_v43 = vmul.f32 %v373_v42, %v289_v40 }
 0x2ac   :  { %v295_v44 = vadd.f32 %v294_v41, %v290_v43 }
 0x2ae   :  { %297 = vst.msk [vmem:[%s488_s5] sm:$0xff] %vm296_vm6, %v295_v44 }
 0x2af   :  { %302 = vsyncpa [#allocation3], 1 }

// kernel: tpu_custom_call.1
= control target key start
LH: loop header
LB: loop body
LE: loop exit
PB: predicated region body
PF: predicated region fallthrough
CT: control target
= control target key end

     0   :  { %10 = vsyncpa [#allocation3], 0  ;;  %s398_s18 = smov [#allocation2]   ;;  %s483_s0 = inlined_call_operand.vmem [shape: f32[8,15], index: 0, kind: input, shape index: {}]   ;;  %s484_s1 = inlined_call_operand.hbm [shape: f32[15,32], index: 1, kind: input, shape index: {}]   ;;  %s485_s2 = inlined_call_operand.vmem [shape: f32[32,32], index: 2, kind: input, shape index: {}]   ;;  %s486_s3 = inlined_call_operand.vmem [shape: f32[32,4], index: 3, kind: input, shape index: {}]   ;;  %s487_s4 = inlined_call_operand.vmem [shape: f32[8,128], index: 4, kind: input, shape index: {}]   ;;  %s488_s5 = inlined_call_operand.vmem [shape: f32[8,4], index: 5, kind: output, shape index: {}]  }
   0x1   :  { %s18_s19 = sshll.u32 %s398_s18, 4  ;;  %s374_s22 = scalar_lea.hbm %s484_s1, 256  ;;  %s19_s19 = int_to_ptr.vmem [resolvable:$true] %s18_s19 }
   0x2   :  { %p375_p0 = scmp.ne.s32.totalorder %s484_s1, %s374_s22  ;;  %p378_p1 = scmp.lt.u32.totalorder %s374_s22, %s484_s1 }
   0x4   :  { %p380_p2 = pnand %p378_p1, %p375_p0 }
   0x6   :  { %383 = shalt.err (!%p380_p2)
}
   0x7   :  { %s384_s27 = scalar_lea.vmem %s19_s19, 256  ;;  %p389_p4 = scmp.lt.s32.totalorder %s19_s19, %s19_s19 }
   0x8   :  { %p385_p3 = scmp.ne.s32.totalorder %s19_s19, %s384_s27  ;;  %p390_p5 = scmp.lt.s32.totalorder %s384_s27, %s384_s27 }
   0xa   :  { %p391_p6 = por %p390_p5, %p389_p4 }
   0xc   :  { %p392_p7 = pnand %p391_p6, %p385_p3 }
   0xe   :  { %395 = shalt.err (!%p392_p7)
}
   0xf   :  { %s399_s28 = smov 128   ;;  %s400_s29 = smov 8  }
  0x10   :  { %24 = dma.hbm_to_vmem [thread:$0]  %s484_s1, 256, %s19_s19, [#allocation3], %s399_s28, %s399_s28, %s400_s29  }
  0x11   :  { %396 = dma.done.wait [#allocation3], 256  }
  0x12   :  { %397 = vsyncadd [#allocation3], 4294967040  ;;  %v401_v0 = vmov 0.0|0.0   ;;  %vm402_vm0 = vmmov 0   ;;  %v403_v1 = vmov 0.0   ;;  %vm46_vm1 = vcmask 1046528  }
  0x13   :  { %349 = vmatprep.subr.bf16.mxu0 %v401_v0  ;;  %353 = vmatprep.subr.bf16.mxu1 %v401_v0  ;;  %v36_v2 = vld [vmem:[#allocation2] sm:$0xff]  ;;  %v37_v3 = vld [vmem:[#allocation2 + $0x8] sm:$0x7f]  ;;  %vm404_vm2 = vmmov 1   ;;  %vm42_vm4 = vcmask 121856   ;;  %v123_v9 = vld [vmem:[%s485_s2 + $0x10] sm:$0xff]  ;;  %v38_v15 = vlaneseq }
  0x14   :  { %324 = vmatprep.mubr.msk.f32.mxu0 %vm402_vm0, %v403_v1  ;;  %335 = vmatprep.mubr.msk.f32.mxu1 %vm402_vm0, %v403_v1  ;;  %vm351_vm3 = vmpackc.low %vm46_vm1, %vm404_vm2  ;;  %v350_v4 = vpack.c.bf16 %v37_v3, %v36_v2  ;;  %v121_v5 = vld [vmem:[%s485_s2] sm:$0xff]  ;;  %v122_v6 = vld [vmem:[%s485_s2 + $0x8] sm:$0xff]  ;;  %vm129_vm5 = vcmask 261120   ;;  %vm296_vm6 = vcmask 31744  }
  0x15   :  { %v354_v7 = vpack.c.bf16 %v122_v6, %v121_v5  ;;  %v34_v8 = vld [vmem:[%s483_s0] sm:$0xff]  ;;  %v124_v10 = vld [vmem:[%s485_s2 + $0x18] sm:$0xff]  ;;  %v205_v13 = vld [vmem:[%s486_s3 + $0x8] sm:$0xff]  ;;  %v39_v16 = vshrl.u32 %v38_v15, 7 }
  0x16   :  { %352 = vmatpush3.bf16.msk.msra.mxu0 %vm351_vm3, %v350_v4  ;;  %v357_v11 = vpack.c.bf16 %v124_v10, %v123_v9  ;;  %v204_v12 = vld [vmem:[%s486_s3] sm:$0xff]  ;;  %v206_v24 = vld [vmem:[%s486_s3 + $0x10] sm:$0xff]  ;;  %v207_v25 = vld [vmem:[%s486_s3 + $0x18] sm:$0xff] }
  0x17   :  { %355 = vmatpush3.bf16.msra.mxu1 %v354_v7  ;;  %359 = vmatprep.subr.bf16.mxu0 %v401_v0  ;;  %v360_v14 = vpack.c.bf16 %v205_v13, %v204_v12  ;;  %v40_v17 = vsub.s32 0, %v39_v16  ;;  %v35_v18 = vld [vmem:[%s487_s4] sm:$0xff]  ;;  %v363_v26 = vpack.c.bf16 %v207_v25, %v206_v24  ;;  %v127_v27 = vsub.s32 1, %v39_v16 }
  0x18   :  { %356 = vmatprep.subr.bf16.mxu1 %v401_v0  ;;  %v210_v33 = vsub.s32 2, %v39_v16  ;;  %v288_v38 = vsub.s32 3, %v39_v16  ;;  %v293_v39 = vsub.s32 4, %v39_v16 }
  0x19   :  { %325 = vmatmul.mubr.msk.f32.vlgmr.msra.gmra.mrb[0].mxu0 %vm42_vm4, %v34_v8  ;;  %v41_v19 = vrot.slane %v35_v18, %v40_v17  ;;  %v128_v28 = vrot.slane %v35_v18, %v127_v27 }
  0x1a   :  { %346 = vmatprep.mubr.msk.f32.mxu0 %vm402_vm0, %v403_v1  ;;  %361 = vmatpush3.bf16.msra.mxu0 %v360_v14  ;;  %v211_v34 = vrot.slane %v35_v18, %v210_v33  ;;  %v289_v40 = vrot.slane %v35_v18, %v288_v38  ;;  %v294_v41 = vrot.slane %v35_v18, %v293_v39 }
  0x1b   :  { %358 = vmatpush3.bf16.msra.mxu1 %v357_v11  ;;  %362 = vmatprep.subr.bf16.mxu0 %v401_v0 }
  0x1e   :  { %364 = vmatpush3.bf16.msra.mxu0 %v363_v26 }
  0xec   :  { %v116_v20 = vpop.f32.mrb[0].mxu0 }
  0xed   :  { %v117_v21 = vadd.f32 %v116_v20, %v41_v19  ;;  %v326_v22 = vpop.f32.mrb[1].mxu0 }
  0xef   :  { %v120_v23 = vmax.f32 %v117_v21, 0.0 }
  0xf1   :  { %336 = vmatmul.mubr.msk.f32.vlgmr.msra.gmra.mrb[0].mxu1 %vm129_vm5, %v120_v23 }
 0x1c4   :  { %v199_v29 = vpop.f32.mrb[0].mxu1 }
 0x1c5   :  { %v200_v30 = vadd.f32 %v199_v29, %v128_v28  ;;  %v337_v31 = vpop.f32.mrb[1].mxu1 }
 0x1c7   :  { %v203_v32 = vmax.f32 %v200_v30, 0.0 }
 0x1c9   :  { %347 = vmatmul.mubr.msk.f32.vlgmr.msra.gmra.mrb[2].mxu0 %vm129_vm5, %v203_v32 }
 0x29c   :  { %v281_v35 = vpop.f32.mrb[2].mxu0 }
 0x29d   :  { %v282_v36 = vadd.f32 %v281_v35, %v211_v34  ;;  %v348_v37 = vpop.f32.mrb[3].mxu0 }
 0x29f   :  { %372 = vtanh.f32 %v282_v36 }
 0x2a9   :  { %v373_v42 = vpop.eup %372 }
 0x2aa   :  { %v290_v43 = vmul.f32 %v373_v42, %v289_v40 }
 0x2ac   :  { %v295_v44 = vadd.f32 %v294_v41, %v290_v43 }
 0x2ae   :  { %297 = vst.msk [vmem:[%s488_s5] sm:$0xff] %vm296_vm6, %v295_v44 }
 0x2af   :  { %302 = vsyncpa [#allocation3], 1 }

</bundles_post_ra>
